<compile_context>
chip_gen: v7x
topology: tpu7x:2x2x1
jax: 0.10.0
libtpu: 0.0.40
codegen_flags: <defaults>
</compile_context>

<pallas_src>
import functools

import jax
import jax.numpy as jnp
from jax.experimental import pallas as pl
from jax.experimental.pallas import tpu as pltpu


def _round_up(x, m):
    return ((x + m - 1) // m) * m


def _global_max_pool_kernel(x_ref, o_ref):
    # x_ref block: (TB, TS, Dp) — a batch tile and a sequence tile.
    # o_ref block: (TB, Dp) — same block for every s step (resident accumulator).
    blk_max = jnp.max(x_ref[...], axis=1)

    @pl.when(pl.program_id(1) == 0)
    def _init():
        o_ref[...] = blk_max

    @pl.when(pl.program_id(1) != 0)
    def _accum():
        o_ref[...] = jnp.maximum(o_ref[...], blk_max)


@functools.partial(jax.jit, static_argnames=("dim",))
def global_max_pool1d(x, dim=1):
    """Pallas TPU implementation of torch.max(x, dim=1)[0] for 3D x."""
    assert x.ndim == 3 and dim == 1, "kernel implements the dim=1 (default) case"
    B, S, D = x.shape
    itemsize = jnp.dtype(x.dtype).itemsize

    # Sublane packing: f32 → 8 rows/vreg, bf16 → 16, int8 → 32.
    sublane = 8 * (4 // itemsize) if itemsize in (1, 2, 4) else 8

    # Lane-dense feature dim (multiple of 128) → unmasked vld / vst.
    Dp = _round_up(D, 128)

    # Batch tile: at least one sublane group (dense output stores), capped so
    # small batches do not over-pad.
    TB = min(_round_up(B, sublane), 8 * sublane)
    Bp = _round_up(B, TB)

    # Sequence tile: one input block ≈ 4 MiB (double-buffered ≈ 8 MiB), which
    # fits the scoped-VMEM budget on v5e/v6e/v7x while staying near the HBM
    # roofline.  Must be a multiple of the sublane packing.
    target_block_bytes = 4 * 1024 * 1024
    ts = (target_block_bytes // (TB * Dp * itemsize)) // sublane * sublane
    TS = min(max(sublane, ts), _round_up(S, sublane))
    Sp = _round_up(S, TS)

    # Pad with the identity of max so padded rows/lanes never win.
    if jnp.issubdtype(x.dtype, jnp.floating):
        pad_val = -jnp.inf
    else:
        pad_val = jnp.iinfo(x.dtype).min
    if (Bp, Sp, Dp) != (B, S, D):
        x = jnp.pad(
            x,
            ((0, Bp - B), (0, Sp - S), (0, Dp - D)),
            mode="constant",
            constant_values=pad_val,
        )

    grid = (Bp // TB, Sp // TS)

    out_padded = pl.pallas_call(
        _global_max_pool_kernel,
        out_shape=jax.ShapeDtypeStruct((Bp, Dp), x.dtype),
        grid_spec=pltpu.PrefetchScalarGridSpec(
            num_scalar_prefetch=0,
            grid=grid,
            in_specs=[pl.BlockSpec((TB, TS, Dp), lambda b, s: (b, s, 0))],
            # Same output block across the s axis → resident max accumulator.
            out_specs=pl.BlockSpec((TB, Dp), lambda b, s: (b, 0)),
        ),
        compiler_params=pltpu.CompilerParams(
            dimension_semantics=("parallel", "arbitrary"),
            vmem_limit_bytes=32 * 1024 * 1024,
        ),
        cost_estimate=pl.CostEstimate(
            flops=Bp * Sp * Dp,
            transcendentals=0,
            bytes_accessed=(Bp * Sp * Dp + Bp * Dp) * itemsize,
        ),
    )(x)

    return out_padded[:B, :D]


if __name__ == "__main__":
    key = jax.random.PRNGKey(0)
    B, S, D = 2, 16, 32  # small shapes: batch=2, seq=16, hidden=32
    x = jax.random.normal(key, (B, S, D), dtype=jnp.float32)

    out = global_max_pool1d(x, dim=1)
    out = jax.block_until_ready(out)

    # Reference check against plain JAX (same semantics as torch.max(x, 1)[0]).
    ref = jnp.max(x, axis=1)
    assert out.shape == (B, D), out.shape
    assert out.dtype == x.dtype, out.dtype
    assert jnp.allclose(out, ref), "mismatch vs reference"

    # Exercise the tiling / padding paths with a non-aligned bf16 shape.
    B2, S2, D2 = 5, 300, 200
    x2 = jax.random.normal(jax.random.PRNGKey(1), (B2, S2, D2), dtype=jnp.bfloat16)
    out2 = jax.block_until_ready(global_max_pool1d(x2, dim=1))
    ref2 = jnp.max(x2, axis=1)
    assert out2.shape == (B2, D2), out2.shape
    assert out2.dtype == x2.dtype, out2.dtype
    assert jnp.array_equal(out2, ref2), "mismatch vs reference (bf16, unaligned)"

    print("KERNEL_OK")
</pallas_src>

<mosaic_0001>
module attributes {stable_mosaic.version = 11 : i64} {
  func.func @_global_max_pool_kernel(%arg0: i32, %arg1: i32, %arg2: memref<8x16x128xf32, #tpu.memory_space<vmem>>, %arg3: memref<8x128xf32, #tpu.memory_space<vmem>>) attributes {dimension_semantics = [#tpu.dimension_semantics<parallel>, #tpu.dimension_semantics<arbitrary>], iteration_bounds = array<i64: 1, 1>, scalar_prefetch = 0 : i64, scratch_operands = 0 : i64, tpu.core_type = #tpu.core_type<tc>, window_params = [{transform_indices = @transform_0, window_bounds = array<i64: 8, 16, 128>}, {transform_indices = @transform_1, window_bounds = array<i64: 8, 128>}]} {
    %c0 = arith.constant 0 : index
    %c0_0 = arith.constant 0 : index
    %c0_1 = arith.constant 0 : index
    %0 = vector.load %arg2[%c0, %c0_0, %c0_1] : memref<8x16x128xf32, #tpu.memory_space<vmem>>, vector<8x16x128xf32>
    %cst = arith.constant dense<0xFF800000> : vector<8x128xf32>
    %1 = vector.multi_reduction <maximumf>, %0, %cst [1] : vector<8x16x128xf32> to vector<8x128xf32>
    %c0_i32 = arith.constant 0 : i32
    %2 = arith.cmpi eq, %arg1, %c0_i32 : i32
    %3 = arith.extui %2 : i1 to i32
    %c0_i32_2 = arith.constant 0 : i32
    %4 = arith.cmpi ne, %3, %c0_i32_2 : i32
    scf.if %4 {
      %c0_5 = arith.constant 0 : index
      %c0_6 = arith.constant 0 : index
      %8 = vector.load %arg3[%c0_5, %c0_6] : memref<8x128xf32, #tpu.memory_space<vmem>>, vector<8x128xf32>
      tpu.vector_store %arg3[%c0_5, %c0_6], %1 {strides = array<i32>} : memref<8x128xf32, #tpu.memory_space<vmem>>, vector<8x128xf32>,
    } else {
    }
    %c0_i32_3 = arith.constant 0 : i32
    %5 = arith.cmpi ne, %arg1, %c0_i32_3 : i32
    %6 = arith.extui %5 : i1 to i32
    %c0_i32_4 = arith.constant 0 : i32
    %7 = arith.cmpi ne, %6, %c0_i32_4 : i32
    scf.if %7 {
      %c0_5 = arith.constant 0 : index
      %c0_6 = arith.constant 0 : index
      %8 = vector.load %arg3[%c0_5, %c0_6] : memref<8x128xf32, #tpu.memory_space<vmem>>, vector<8x128xf32>
      %9 = arith.maximumf %8, %1 : vector<8x128xf32>
      %c0_7 = arith.constant 0 : index
      %c0_8 = arith.constant 0 : index
      %10 = vector.load %arg3[%c0_7, %c0_8] : memref<8x128xf32, #tpu.memory_space<vmem>>, vector<8x128xf32>
      tpu.vector_store %arg3[%c0_7, %c0_8], %9 {strides = array<i32>} : memref<8x128xf32, #tpu.memory_space<vmem>>, vector<8x128xf32>,
    } else {
    }
    return
  }
  func.func @transform_0(%arg0: i32, %arg1: i32) -> (i32, i32, i32) {
    %c0_i32 = arith.constant 0 : i32
    %c0_i32_0 = arith.constant 0 : i32
    return %arg0, %arg1, %c0_i32 : i32, i32, i32
  }
  func.func @transform_1(%arg0: i32, %arg1: i32) -> (i32, i32) {
    %c0_i32 = arith.constant 0 : i32
    %c0_i32_0 = arith.constant 0 : i32
    return %arg0, %c0_i32 : i32, i32
  }
}

</mosaic_0001>

<bundles_post_ra>
// kernel: global_max_pool1d.1
= control target key start
LH: loop header
LB: loop body
LE: loop exit
PB: predicated region body
PF: predicated region fallthrough
CT: control target
= control target key end

     0   :  { %vm92_vm0 = vcmask 1041409   ;;  %vm94_vm1 = vcmask 1042434   ;;  %vm96_vm2 = vcmask 1043459   ;;  %vm98_vm3 = vcmask 1044484   ;;  %s205_s0 = inlined_call_operand.vmem [shape: f32[8,16,128], index: 0, kind: input, shape index: {}]   ;;  %s206_s1 = inlined_call_operand.vmem [shape: f32[8,128], index: 1, kind: output, shape index: {}]  }
   0x1   :  { %v8_v0 = vld [vmem:[%s205_s0] sm:$0xff]  ;;  %v9_v1 = vld [vmem:[%s205_s0 + $0x8] sm:$0xff]  ;;  %v10_v2 = vld [vmem:[%s205_s0 + $0x10] sm:$0xff]  ;;  %vm100_vm4 = vcmask 1045509   ;;  %vm102_vm5 = vcmask 1046534   ;;  %vm104_vm6 = vcmask 1047559  }
   0x2   :  { %v11_v3 = vld [vmem:[%s205_s0 + $0x18] sm:$0xff]  ;;  %v12_v4 = vld [vmem:[%s205_s0 + $0x20] sm:$0xff]  ;;  %v13_v5 = vld [vmem:[%s205_s0 + $0x28] sm:$0xff]  ;;  %v24_v6 = vmax.f32 %v8_v0, %v9_v1 }
   0x3   :  { %v14_v7 = vld [vmem:[%s205_s0 + $0x30] sm:$0xff]  ;;  %v15_v8 = vld [vmem:[%s205_s0 + $0x38] sm:$0xff]  ;;  %v16_v9 = vld [vmem:[%s205_s0 + $0x40] sm:$0xff]  ;;  %v31_v10 = vmax.f32 %v10_v2, %v11_v3  ;;  %v38_v11 = vmax.f32 %v12_v4, %v13_v5 }
   0x4   :  { %v17_v12 = vld [vmem:[%s205_s0 + $0x48] sm:$0xff]  ;;  %v18_v13 = vld [vmem:[%s205_s0 + $0x50] sm:$0xff]  ;;  %v19_v14 = vld [vmem:[%s205_s0 + $0x58] sm:$0xff]  ;;  %v25_v15 = vrot.slane %v24_v6, 4  ;;  %v45_v16 = vmax.f32 %v14_v7, %v15_v8 }
   0x5   :  { %v20_v17 = vld [vmem:[%s205_s0 + $0x60] sm:$0xff]  ;;  %v21_v18 = vld [vmem:[%s205_s0 + $0x68] sm:$0xff]  ;;  %v22_v19 = vld [vmem:[%s205_s0 + $0x70] sm:$0xff]  ;;  %v32_v20 = vrot.slane %v31_v10, 4  ;;  %v39_v21 = vrot.slane %v38_v11, 4  ;;  %v52_v22 = vmax.f32 %v16_v9, %v17_v12  ;;  %v59_v23 = vmax.f32 %v18_v13, %v19_v14 }
   0x6   :  { %v23_v24 = vld [vmem:[%s205_s0 + $0x78] sm:$0xff]  ;;  %v26_v25 = vmax.f32 %v24_v6, %v25_v15  ;;  %v46_v26 = vrot.slane %v45_v16, 4  ;;  %v66_v27 = vmax.f32 %v20_v17, %v21_v18 }
   0x7   :  { %v33_v28 = vmax.f32 %v31_v10, %v32_v20  ;;  %v40_v29 = vmax.f32 %v38_v11, %v39_v21  ;;  %v53_v30 = vrot.slane %v52_v22, 4  ;;  %v60_v31 = vrot.slane %v59_v23, 4 }
   0x8   :  { %v27_v32 = vrot.slane %v26_v25, 2  ;;  %v47_v33 = vmax.f32 %v45_v16, %v46_v26  ;;  %v67_v34 = vrot.slane %v66_v27, 4  ;;  %v73_v35 = vmax.f32 %v22_v19, %v23_v24 }
   0x9   :  { %v34_v36 = vrot.slane %v33_v28, 2  ;;  %v41_v37 = vrot.slane %v40_v29, 2  ;;  %v54_v38 = vmax.f32 %v52_v22, %v53_v30  ;;  %v61_v39 = vmax.f32 %v59_v23, %v60_v31 }
   0xa   :  { %v28_v40 = vmax.f32 %v26_v25, %v27_v32  ;;  %v48_v41 = vrot.slane %v47_v33, 2  ;;  %v68_v42 = vmax.f32 %v66_v27, %v67_v34  ;;  %v74_v43 = vrot.slane %v73_v35, 4 }
   0xb   :  { %v35_v44 = vmax.f32 %v33_v28, %v34_v36  ;;  %v42_v45 = vmax.f32 %v40_v29, %v41_v37  ;;  %v55_v46 = vrot.slane %v54_v38, 2  ;;  %v62_v47 = vrot.slane %v61_v39, 2 }
   0xc   :  { %v29_v48 = vrot.slane %v28_v40, 1  ;;  %v49_v49 = vmax.f32 %v47_v33, %v48_v41  ;;  %v69_v50 = vrot.slane %v68_v42, 2  ;;  %v75_v51 = vmax.f32 %v73_v35, %v74_v43 }
   0xd   :  { %v36_v52 = vrot.slane %v35_v44, 1  ;;  %v43_v53 = vrot.slane %v42_v45, 1  ;;  %v56_v54 = vmax.f32 %v54_v38, %v55_v46  ;;  %v63_v55 = vmax.f32 %v61_v39, %v62_v47 }
   0xe   :  { %v30_v56 = vmax.f32 %v28_v40, %v29_v48  ;;  %v50_v57 = vrot.slane %v49_v49, 1  ;;  %v70_v58 = vmax.f32 %v68_v42, %v69_v50  ;;  %v76_v59 = vrot.slane %v75_v51, 2 }
   0xf   :  { %v37_v60 = vmax.f32 %v35_v44, %v36_v52  ;;  %v44_v61 = vmax.f32 %v42_v45, %v43_v53  ;;  %v57_v62 = vrot.slane %v56_v54, 1  ;;  %v64_v63 = vrot.slane %v63_v55, 1 }
  0x10   :  { %v51_v0 = vmax.f32 %v49_v49, %v50_v57  ;;  %v71_v1 = vrot.slane %v70_v58, 1  ;;  %v77_v2 = vmax.f32 %v75_v51, %v76_v59 }
  0x11   :  { %v58_v3 = vmax.f32 %v56_v54, %v57_v62  ;;  %v65_v4 = vmax.f32 %v63_v55, %v64_v63  ;;  %v93_v5 = vsel %vm92_vm0, %v37_v60, %v30_v56 }
  0x12   :  { %v72_v6 = vmax.f32 %v70_v58, %v71_v1  ;;  %v78_v7 = vrot.slane %v77_v2, 1  ;;  %v95_v8 = vsel %vm94_vm1, %v44_v61, %v93_v5 }
  0x13   :  { %v97_v9 = vsel %vm96_vm2, %v51_v0, %v95_v8 }
  0x14   :  { %v79_v10 = vmax.f32 %v77_v2, %v78_v7  ;;  %v99_v11 = vsel %vm98_vm3, %v58_v3, %v97_v9 }
  0x15   :  { %v101_v12 = vsel %vm100_vm4, %v65_v4, %v99_v11 }
  0x16   :  { %v103_v13 = vsel %vm102_vm5, %v72_v6, %v101_v12 }
  0x17   :  { %v105_v14 = vsel %vm104_vm6, %v79_v10, %v103_v13 }
  0x18   :  { %107 = vst [vmem:[%s206_s1] sm:$0xff] %v105_v14 }

</bundles_post_ra>
